<compile_context>
chip_gen: v7x
topology: tpu7x:2x2x1
jax: 0.10.0
libtpu: 0.0.40
codegen_flags: <defaults>
</compile_context>

<pallas_src>
import functools

import jax
import jax.numpy as jnp
from jax.experimental import pallas as pl
from jax.experimental.pallas import tpu as pltpu


# ----------------------------------------------------------------------------
# generic tiled matmul kernel (conv-as-im2col and fc hot path)
# ----------------------------------------------------------------------------
def _matmul_kernel(a_ref, b_ref, o_ref, acc_ref):
    @pl.when(pl.program_id(2) == 0)
    def _():
        acc_ref[...] = jnp.zeros_like(acc_ref)

    acc_ref[...] += jnp.dot(a_ref[...], b_ref[...],
                            preferred_element_type=jnp.float32)

    @pl.when(pl.program_id(2) == pl.num_programs(2) - 1)
    def _():
        o_ref[...] = acc_ref[...].astype(o_ref.dtype)


def _round_up(x, m):
    return (x + m - 1) // m * m


# Per-kernel double-buffered working-set budget.  Conservative for v7x
# (32 MiB scoped / 64 MiB physical VMEM); trivially fits v5e / v6e.
_VMEM_BUDGET = 24 * 1024 * 1024
_VMEM_LIMIT_BYTES = 48 * 1024 * 1024


def _pick_tiles(M, K, N):
    """Choose (tm, tn, tk) for a (M,K)x(K,N) bf16 matmul with f32 accum."""
    tm = min(128, _round_up(M, 16))          # bf16 packs 2 rows/sublane
    Nr = _round_up(N, 128)
    if Nr >= 1024:
        tn = 512
    elif Nr >= 256:
        tn = 256
    else:
        tn = Nr
    # v7x has 2 TensorCores: try to expose >=2 parallel output tiles.
    m_tiles = _round_up(M, tm) // tm
    if m_tiles == 1 and _round_up(N, tn) // tn == 1 and Nr > 128:
        tn = max(128, (Nr // 2) // 128 * 128)

    Kr = _round_up(K, 128)

    def ws_bytes(tk):
        # 2x (A tile + B tile + out tile) for double buffering, + f32 acc.
        return 2 * (tm * tk * 2 + tk * tn * 2 + tm * tn * 4) + tm * tn * 4

    if ws_bytes(Kr) <= _VMEM_BUDGET:
        tk = Kr                               # single K step
    else:
        best_key, tk = None, 128
        for cand in range(128, 2048 + 128, 128):
            if ws_bytes(cand) > _VMEM_BUDGET:
                break
            Kp = _round_up(K, cand)
            key = (Kp, Kp // cand)            # least padding, then fewest steps
            if best_key is None or key < best_key:
                best_key, tk = key, cand
    return tm, tn, tk


def pallas_matmul(a, b, out_dtype=jnp.bfloat16):
    """a: (M, K), b: (K, N) -> (M, N) in out_dtype.  Operands cast to bf16,
    accumulation in f32 on the MXU."""
    M, K = a.shape
    K2, N = b.shape
    assert K == K2
    if a.dtype != jnp.bfloat16:
        a = a.astype(jnp.bfloat16)
    if b.dtype != jnp.bfloat16:
        b = b.astype(jnp.bfloat16)

    tm, tn, tk = _pick_tiles(M, K, N)
    Mp, Np, Kp = _round_up(M, tm), _round_up(N, tn), _round_up(K, tk)

    if (Mp, Kp) != (M, K):
        a = jnp.pad(a, ((0, Mp - M), (0, Kp - K)))
    if (Kp, Np) != (K, N):
        b = jnp.pad(b, ((0, Kp - K), (0, Np - N)))

    out = pl.pallas_call(
        _matmul_kernel,
        out_shape=jax.ShapeDtypeStruct((Mp, Np), out_dtype),
        grid_spec=pltpu.PrefetchScalarGridSpec(
            num_scalar_prefetch=0,
            # N leads so at least one parallel axis has >1 tile in late layers.
            grid=(Np // tn, Mp // tm, Kp // tk),
            in_specs=[
                pl.BlockSpec((tm, tk), lambda j, i, k: (i, k)),
                pl.BlockSpec((tk, tn), lambda j, i, k: (k, j)),
            ],
            out_specs=pl.BlockSpec((tm, tn), lambda j, i, k: (i, j)),
            scratch_shapes=[pltpu.VMEM((tm, tn), jnp.float32)],
        ),
        compiler_params=pltpu.CompilerParams(
            dimension_semantics=("parallel", "parallel", "arbitrary"),
            vmem_limit_bytes=_VMEM_LIMIT_BYTES),
    )(a, b)
    if (Mp, Np) != (M, N):
        out = out[:M, :N]
    return out


# ----------------------------------------------------------------------------
# batchnorm (training-mode batch statistics) + optional ReLU kernel
# ----------------------------------------------------------------------------
# TODO(synk): at large batch/resolution these single-block elementwise kernels
# should become a tiled two-pass (stats then normalize) formulation to stay
# within VMEM; at this problem size a single block is the fastest option.
# TODO(synk): for C < 128 layers, present a lane-dense (rows/2, 2C) layout and
# combine the two parity stat halves to avoid masked stores.
def _bn_kernel(x_ref, g_ref, b_ref, o_ref, *, relu, eps):
    x = x_ref[...].astype(jnp.float32)               # (rows, C)
    mean = jnp.mean(x, axis=0, keepdims=True)
    var = jnp.mean(jnp.square(x - mean), axis=0, keepdims=True)
    y = (x - mean) * jax.lax.rsqrt(var + eps) * g_ref[...] + b_ref[...]
    if relu:
        y = jnp.maximum(y, 0.0)
    o_ref[...] = y.astype(o_ref.dtype)


def batchnorm_act(x, gamma, beta, relu, eps=1e-5):
    N, H, W, C = x.shape
    xf = x.reshape(-1, C)
    out = pl.pallas_call(
        functools.partial(_bn_kernel, relu=relu, eps=eps),
        out_shape=jax.ShapeDtypeStruct(xf.shape, jnp.bfloat16),
    )(xf, gamma.reshape(1, C), beta.reshape(1, C))
    return out.reshape(N, H, W, C)


# ----------------------------------------------------------------------------
# fused bottleneck tails:  relu(bn(x) + idn)  and  relu(bn(x) + bn(idn))
# ----------------------------------------------------------------------------
def _bn_add_relu_kernel(x_ref, g_ref, b_ref, r_ref, o_ref, *, eps):
    x = x_ref[...].astype(jnp.float32)
    mean = jnp.mean(x, axis=0, keepdims=True)
    var = jnp.mean(jnp.square(x - mean), axis=0, keepdims=True)
    y = (x - mean) * jax.lax.rsqrt(var + eps) * g_ref[...] + b_ref[...]
    o_ref[...] = jnp.maximum(y + r_ref[...].astype(jnp.float32),
                             0.0).astype(o_ref.dtype)


def bn_add_relu(x, g, b, res, eps=1e-5):
    N, H, W, C = x.shape
    out = pl.pallas_call(
        functools.partial(_bn_add_relu_kernel, eps=eps),
        out_shape=jax.ShapeDtypeStruct((N * H * W, C), jnp.bfloat16),
    )(x.reshape(-1, C), g.reshape(1, C), b.reshape(1, C), res.reshape(-1, C))
    return out.reshape(N, H, W, C)


def _bn2_add_relu_kernel(x_ref, gx_ref, bx_ref, y_ref, gy_ref, by_ref, o_ref,
                         *, eps):
    x = x_ref[...].astype(jnp.float32)
    y = y_ref[...].astype(jnp.float32)
    mx = jnp.mean(x, axis=0, keepdims=True)
    vx = jnp.mean(jnp.square(x - mx), axis=0, keepdims=True)
    my = jnp.mean(y, axis=0, keepdims=True)
    vy = jnp.mean(jnp.square(y - my), axis=0, keepdims=True)
    xn = (x - mx) * jax.lax.rsqrt(vx + eps) * gx_ref[...] + bx_ref[...]
    yn = (y - my) * jax.lax.rsqrt(vy + eps) * gy_ref[...] + by_ref[...]
    o_ref[...] = jnp.maximum(xn + yn, 0.0).astype(o_ref.dtype)


def bn2_add_relu(x, gx, bx, y, gy, by, eps=1e-5):
    N, H, W, C = x.shape
    out = pl.pallas_call(
        functools.partial(_bn2_add_relu_kernel, eps=eps),
        out_shape=jax.ShapeDtypeStruct((N * H * W, C), jnp.bfloat16),
    )(x.reshape(-1, C), gx.reshape(1, C), bx.reshape(1, C),
      y.reshape(-1, C), gy.reshape(1, C), by.reshape(1, C))
    return out.reshape(N, H, W, C)


# ----------------------------------------------------------------------------
# maxpool 3x3 / stride 2 / pad 1 : 9 shifted windows -> one max kernel
# ----------------------------------------------------------------------------
# TODO(synk): read the padded input once and compute the 3x3 max in-kernel
# (strided sublane slices / pltpu.roll) instead of 9 XLA-built windows.
def _max9_kernel(*refs):
    out_ref = refs[-1]
    m = refs[0][...]
    for r in refs[1:-1]:
        m = jnp.maximum(m, r[...])
    out_ref[...] = m


def maxpool_3x3_s2(x):
    N, H, W, C = x.shape
    k, s, p = 3, 2, 1
    OH = (H + 2 * p - k) // s + 1
    OW = (W + 2 * p - k) // s + 1
    xp = jnp.pad(x, ((0, 0), (p, p), (p, p), (0, 0)),
                 constant_values=-jnp.inf)
    total = N * OH * OW * C
    # present a lane-dense last dim (128) to the kernel when possible
    flat_shape = (total // 128, 128) if total % 128 == 0 else (N * OH * OW, C)
    wins = []
    for ki in range(k):
        for kj in range(k):
            wins.append(xp[:, ki:ki + s * (OH - 1) + 1:s,
                           kj:kj + s * (OW - 1) + 1:s, :].reshape(flat_shape))
    out = pl.pallas_call(
        _max9_kernel,
        out_shape=jax.ShapeDtypeStruct(flat_shape, x.dtype),
    )(*wins)
    return out.reshape(N, OH, OW, C)


# ----------------------------------------------------------------------------
# adaptive average pool to (1,1) -> (N, C)
# ----------------------------------------------------------------------------
def _avgpool_kernel(x_ref, o_ref):
    o_ref[...] = jnp.mean(x_ref[...].astype(jnp.float32), axis=1)


def avgpool_to_vec(x):
    N, H, W, C = x.shape
    xr = x.reshape(N, H * W, C)
    return pl.pallas_call(
        _avgpool_kernel,
        out_shape=jax.ShapeDtypeStruct((N, C), jnp.float32),
    )(xr)


# ----------------------------------------------------------------------------
# convolution = im2col (glue, in bf16) + Pallas matmul
# ----------------------------------------------------------------------------
# TODO(synk): fold the 3x3/7x7 im2col taps into the matmul K grid (shifted
# window DMAs) to avoid the stacked HBM intermediate entirely.
def conv2d(x, w, stride, padding):
    """x: (N,H,W,Cin) NHWC bf16, w: (KH,KW,Cin,Cout)."""
    N, H, W, Cin = x.shape
    KH, KW, _, Cout = w.shape
    OH = (H + 2 * padding - KH) // stride + 1
    OW = (W + 2 * padding - KW) // stride + 1

    xb = x.astype(jnp.bfloat16)
    wb = w.astype(jnp.bfloat16)

    if KH == 1 and KW == 1 and padding == 0:
        patches = xb[:, ::stride, ::stride, :].reshape(-1, Cin)
    else:
        xp = jnp.pad(xb, ((0, 0), (padding, padding), (padding, padding),
                          (0, 0)))
        cols = []
        for ki in range(KH):
            for kj in range(KW):
                cols.append(xp[:, ki:ki + stride * (OH - 1) + 1:stride,
                               kj:kj + stride * (OW - 1) + 1:stride, :])
        patches = jnp.concatenate(cols, axis=-1).reshape(-1, KH * KW * Cin)

    wm = wb.reshape(KH * KW * Cin, Cout)
    out = pallas_matmul(patches, wm, out_dtype=jnp.bfloat16)
    return out.reshape(N, OH, OW, Cout)


def linear(x, w, b):
    """x: (M, K), w: (K, N), b: (N,) - bias folded into the matmul."""
    ones = jnp.ones((x.shape[0], 1), x.dtype)
    x_aug = jnp.concatenate([x, ones], axis=1)
    w_aug = jnp.concatenate([w, b[None, :]], axis=0)
    return pallas_matmul(x_aug, w_aug, out_dtype=jnp.float32)


# ----------------------------------------------------------------------------
# ResNet-101 (Bottleneck blocks [3, 4, 23, 3]) with synthetic parameters
# ----------------------------------------------------------------------------
class _KeyGen:
    def __init__(self, key):
        self._key = key
        self._n = 0

    def next(self):
        self._n += 1
        return jax.random.fold_in(self._key, self._n)


def _conv_w(kg, kh, kw, cin, cout):
    return 0.05 * jax.random.normal(kg.next(), (kh, kw, cin, cout), jnp.float32)


def _bn_p(kg, c):
    g = 1.0 + 0.1 * jax.random.normal(kg.next(), (c,), jnp.float32)
    b = 0.1 * jax.random.normal(kg.next(), (c,), jnp.float32)
    return g, b


def make_resnet101_params(key, num_classes=5):
    # TODO(synk): pretrained ImageNet weights cannot be loaded here; parameters
    # are deterministic synthetic values with the exact ResNet-101 shapes.
    kg = _KeyGen(key)
    params = {}
    params["conv1"] = _conv_w(kg, 7, 7, 3, 64)
    params["bn1"] = _bn_p(kg, 64)

    layers_cfg = [(64, 3), (128, 4), (256, 23), (512, 3)]
    inplanes = 64
    layers = []
    for li, (planes, nblocks) in enumerate(layers_cfg):
        first_stride = 1 if li == 0 else 2
        blocks = []
        for bi in range(nblocks):
            s = first_stride if bi == 0 else 1
            p = {"stride": s}
            p["w1"] = _conv_w(kg, 1, 1, inplanes, planes)
            p["g1"], p["b1"] = _bn_p(kg, planes)
            p["w2"] = _conv_w(kg, 3, 3, planes, planes)
            p["g2"], p["b2"] = _bn_p(kg, planes)
            p["w3"] = _conv_w(kg, 1, 1, planes, planes * 4)
            p["g3"], p["b3"] = _bn_p(kg, planes * 4)
            if s != 1 or inplanes != planes * 4:
                p["wd"] = _conv_w(kg, 1, 1, inplanes, planes * 4)
                p["gd"], p["bd"] = _bn_p(kg, planes * 4)
            blocks.append(p)
            inplanes = planes * 4
        layers.append(blocks)
    params["layers"] = layers
    params["fc_w"] = 0.02 * jax.random.normal(kg.next(), (2048, num_classes),
                                              jnp.float32)
    params["fc_b"] = 0.01 * jax.random.normal(kg.next(), (num_classes,),
                                              jnp.float32)
    return params


def bottleneck(x, p):
    s = p["stride"]
    out = conv2d(x, p["w1"], stride=1, padding=0)
    out = batchnorm_act(out, p["g1"], p["b1"], relu=True)
    out = conv2d(out, p["w2"], stride=s, padding=1)
    out = batchnorm_act(out, p["g2"], p["b2"], relu=True)
    out = conv2d(out, p["w3"], stride=1, padding=0)
    if "wd" in p:
        idn = conv2d(x, p["wd"], stride=s, padding=0)
        return bn2_add_relu(out, p["g3"], p["b3"], idn, p["gd"], p["bd"])
    return bn_add_relu(out, p["g3"], p["b3"], x)


def resnet101_forward(params, x_nchw):
    x = jnp.transpose(x_nchw, (0, 2, 3, 1)).astype(jnp.bfloat16)  # NCHW->NHWC
    x = conv2d(x, params["conv1"], stride=2, padding=3)
    x = batchnorm_act(x, params["bn1"][0], params["bn1"][1], relu=True)
    x = maxpool_3x3_s2(x)
    for blocks in params["layers"]:
        for p in blocks:
            x = bottleneck(x, p)
    x = avgpool_to_vec(x)                             # (N, 2048) f32
    return linear(x, params["fc_w"], params["fc_b"])  # (N, 5) f32


if __name__ == "__main__":
    key = jax.random.PRNGKey(0)
    pkey, xkey = jax.random.split(key)
    params = make_resnet101_params(pkey, num_classes=5)
    # PyTorch module expects NCHW 3-channel images; small spatial size.
    x = jax.random.normal(xkey, (2, 3, 64, 64), jnp.float32)
    logits = resnet101_forward(params, x)
    logits = jax.block_until_ready(logits)
    assert logits.shape == (2, 5), logits.shape
    assert bool(jnp.all(jnp.isfinite(logits)))
    print("KERNEL_OK")
</pallas_src>

<mosaic_0001>
module attributes {stable_mosaic.version = 11 : i64} {
  func.func @_matmul_kernel(%arg0: i32, %arg1: i32, %arg2: i32, %arg3: memref<128x256xbf16, #tpu.memory_space<vmem>>, %arg4: memref<256x128xbf16, #tpu.memory_space<vmem>>, %arg5: memref<128x128xbf16, #tpu.memory_space<vmem>>, %arg6: memref<128x128xf32, #tpu.memory_space<vmem>>) attributes {dimension_semantics = [#tpu.dimension_semantics<parallel>, #tpu.dimension_semantics<parallel>, #tpu.dimension_semantics<arbitrary>], iteration_bounds = array<i64: 1, 16, 1>, scalar_prefetch = 0 : i64, scratch_operands = 1 : i64, tpu.core_type = #tpu.core_type<tc>, window_params = [{transform_indices = @transform_0, window_bounds = array<i64: 128, 256>}, {transform_indices = @transform_1, window_bounds = array<i64: 256, 128>}, {transform_indices = @transform_2, window_bounds = array<i64: 128, 128>}]} {
    %c0_i32 = arith.constant 0 : i32
    %0 = arith.cmpi eq, %arg2, %c0_i32 : i32
    %1 = arith.extui %0 : i1 to i32
    %c0_i32_0 = arith.constant 0 : i32
    %2 = arith.cmpi ne, %1, %c0_i32_0 : i32
    scf.if %2 {
      %cst_10 = arith.constant 0.000000e+00 : f32
      %12 = vector.broadcast %cst_10 : f32 to vector<128x128xf32>
      %c0_11 = arith.constant 0 : index
      %c0_12 = arith.constant 0 : index
      %13 = vector.load %arg6[%c0_11, %c0_12] : memref<128x128xf32, #tpu.memory_space<vmem>>, vector<128x128xf32>
      tpu.vector_store %arg6[%c0_11, %c0_12], %12 {strides = array<i32>} : memref<128x128xf32, #tpu.memory_space<vmem>>, vector<128x128xf32>,
    } else {
    }
    %c0 = arith.constant 0 : index
    %c0_1 = arith.constant 0 : index
    %3 = vector.load %arg6[%c0, %c0_1] : memref<128x128xf32, #tpu.memory_space<vmem>>, vector<128x128xf32>
    %c0_2 = arith.constant 0 : index
    %c0_3 = arith.constant 0 : index
    %4 = vector.load %arg3[%c0_2, %c0_3] : memref<128x256xbf16, #tpu.memory_space<vmem>>, vector<128x256xbf16>
    %c0_4 = arith.constant 0 : index
    %c0_5 = arith.constant 0 : index
    %5 = vector.load %arg4[%c0_4, %c0_5] : memref<256x128xbf16, #tpu.memory_space<vmem>>, vector<256x128xbf16>
    %cst = arith.constant dense<0.000000e+00> : vector<128x128xf32>
    %6 = tpu.matmul %4, %5, %cst {dimension_numbers = #tpu.dot_dimension_numbers<[1], [0], [0], [1], [0, 0, 1, 1], [], []>} : vector<128x256xbf16>, vector<256x128xbf16>, vector<128x128xf32> -> vector<128x128xf32>
    %7 = arith.addf %3, %6 : vector<128x128xf32>
    %c0_6 = arith.constant 0 : index
    %c0_7 = arith.constant 0 : index
    %8 = vector.load %arg6[%c0_6, %c0_7] : memref<128x128xf32, #tpu.memory_space<vmem>>, vector<128x128xf32>
    tpu.vector_store %arg6[%c0_6, %c0_7], %7 {strides = array<i32>} : memref<128x128xf32, #tpu.memory_space<vmem>>, vector<128x128xf32>,
    %c0_i32_8 = arith.constant 0 : i32
    %9 = arith.cmpi eq, %arg2, %c0_i32_8 : i32
    %10 = arith.extui %9 : i1 to i32
    %c0_i32_9 = arith.constant 0 : i32
    %11 = arith.cmpi ne, %10, %c0_i32_9 : i32
    scf.if %11 {
      %c0_10 = arith.constant 0 : index
      %c0_11 = arith.constant 0 : index
      %12 = vector.load %arg6[%c0_10, %c0_11] : memref<128x128xf32, #tpu.memory_space<vmem>>, vector<128x128xf32>
      %13 = arith.truncf %12 : vector<128x128xf32> to vector<128x128xbf16>
      %c0_12 = arith.constant 0 : index
      %c0_13 = arith.constant 0 : index
      %14 = vector.load %arg5[%c0_12, %c0_13] : memref<128x128xbf16, #tpu.memory_space<vmem>>, vector<128x128xbf16>
      tpu.vector_store %arg5[%c0_12, %c0_13], %13 {strides = array<i32>} : memref<128x128xbf16, #tpu.memory_space<vmem>>, vector<128x128xbf16>,
    } else {
    }
    return
  }
  func.func @transform_0(%arg0: i32, %arg1: i32, %arg2: i32) -> (i32, i32) {
    %c0_i32 = arith.constant 0 : i32
    return %arg1, %arg2 : i32, i32
  }
  func.func @transform_1(%arg0: i32, %arg1: i32, %arg2: i32) -> (i32, i32) {
    %c0_i32 = arith.constant 0 : i32
    return %arg2, %arg0 : i32, i32
  }
  func.func @transform_2(%arg0: i32, %arg1: i32, %arg2: i32) -> (i32, i32) {
    %c0_i32 = arith.constant 0 : i32
    return %arg1, %arg0 : i32, i32
  }
}

</mosaic_0001>

<bundles_post_ra>
// kernel: tpu_custom_call.1
= control target key start
LH: loop header
LB: loop body
LE: loop exit
PB: predicated region body
PF: predicated region fallthrough
CT: control target
= control target key end

     0   :  { %7 = vsyncpa [#allocation4], 0  ;;  %s1573_s0 = inlined_call_operand.hbm [shape: bf16[2048,256], index: 0, kind: input, shape index: {}]   ;;  %s1574_s1 = inlined_call_operand.hbm [shape: bf16[256,128], index: 1, kind: input, shape index: {}]   ;;  %s1575_s2 = inlined_call_operand.hbm [shape: bf16[2048,128], index: 2, kind: output, shape index: {}]  }
   0x1   :  { %9 = vsyncpa [#allocation4 + $0x1], 0 }
   0x2   :  { %10 = vsyncpa [#allocation7], 0 }
   0x3   :  { %11 = vsyncpa [#allocation5], 0 }
   0x4   :  { %13 = vsyncpa [#allocation5 + $0x1], 0  ;;  %s1326_s9 = smov 0   ;;  %s1328_s10 = smov 0  }
   0x5   :  { %s1330_s11 = smov 0   ;;  %s1332_s12 = smov 0  }
   0x6   :  { %s1334_s13 = smov 0   ;;  %s1336_s14 = smov 0  }
   0x7 LB: > { %s825_s15 = sadd.s32 4294967295, %s1300_s14   ;;  %s826_s16 = sadd.s32 4294967294, %s1300_s14   ;;  %s1300_s14 = sphi %s1336_s14, %s19_s14   ;;  %s1296_s13 = sphi %s1334_s13, %s1598_s13   ;;  %s1292_s12 = sphi %s1332_s12, %s1597_s12   ;;  %s1288_s11 = sphi %s1330_s11, %s1596_s11   ;;  %s1284_s10 = sphi %s1328_s10, %s1595_s10   ;;  %s1280_s9 = sphi %s1326_s9, %s1594_s9  }
   0x8   : > { %p60_p0 = scmp.ne.s32.totalorder %s1284_s10, %s1280_s9  ;;  %p1360_p1 = scmp.eq.s32.totalorder %s825_s15, 0 }
   0x9   : > { %p1364_p2 = scmp.eq.s32.totalorder %s825_s15, 15  ;;  %p120_p3 = scmp.eq.s32.totalorder %s826_s16, 15 }
   0xa   : > { %s1580_s17 = scalar_select %p1360_p1, 1, 0 }
   0xb   : > { %s1581_s18 = scalar_select %p1364_p2, 1, 0 }
   0xc   : > { %p1370_p4 = por %p1360_p1, %p60_p0  ;;  %p827_p5 = scmp.ge.s32.totalorder %s1300_s14, 1 }
   0xd   : > { %p1375_p6 = por %p120_p3, %p60_p0  ;;  %p127_p7 = scmp.lt.s32.totalorder %s1300_s14, 17 }
   0xe   : > { %s1582_s19 = scalar_select %p1370_p4, 1, 0 }
   0xf   : > { %s1583_s20 = scalar_select %p1375_p6, 1, 0 }
  0x10   : > { %p1380_p8 = pnand %p827_p5, %p127_p7  ;;  %s1302_s22 = smov [#allocation6]  }
  0x11   : > { %s143_s23 = sshll.u32 %s1302_s22, 4  ;;  %s34_s25 = sadd.s32 1, %s1296_s13  ;;  %s144_s23 = int_to_ptr.vmem [resolvable:$true] %s143_s23 }
  0x12   : > { %s1584_s21 = scalar_select %p1380_p8, 1, 0 }
  0x13   : > { %p1045_p9 = pneg %p1380_p8  ;;  %s1156_s28 = scalar_lea.hbm %s1574_s1, 2048 }
  0x14   : > { %p1157_p11 = scmp.ne.s32.totalorder %s1574_s1, %s1156_s28  ;;  %p1163_p3 = scmp.lt.u32.totalorder %s1156_s28, %s1574_s1 }
  0x15   : > { %p1388_p10 = pnand %p1045_p9, %p1360_p1 }
  0x17   : > { %p1158_p12 = pneg %p1388_p10 }
  0x19   : > { %p1159_p13 = pnand %p1158_p12, %p1157_p11 }
  0x1b   : > { %p1160_p0 = pneg %p1159_p13 }
  0x1d   : > { %p1165_p5 = pnand %p1163_p3, %p1160_p0 }
  0x1f   : > { %1168 = shalt.err (!%p1165_p5)
}
  0x20   : > { %s1169_s5 = scalar_lea.vmem %s144_s23, 2048  ;;  %p1177_p1 = scmp.lt.s32.totalorder %s144_s23, %s144_s23 }
  0x21   : > { %p1170_p7 = scmp.ne.s32.totalorder %s144_s23, %s1169_s5  ;;  %p1178_p4 = scmp.lt.s32.totalorder %s1169_s5, %s1169_s5 }
  0x23   : > { %p1172_p9 = pnand %p1170_p7, %p1158_p12  ;;  %p1179_p8 = por %p1178_p4, %p1177_p1 }
  0x25   : > { %p1173_p6 = pneg %p1172_p9 }
  0x27   : > { %p1180_p2 = pnand %p1179_p8, %p1173_p6 }
  0x29   : > { %1183 = shalt.err (!%p1180_p2)
}
  0x2a   : > { %s1303_s6 = smov 64   ;;  %s1304_s7 = smov 4  }
  0x2b   : > { %1048 = dma.hbm_to_vmem [thread:$0]  (!%p1388_p10), %s1574_s1, 2048, %s144_s23, [#allocation7], %s1303_s6, %s1303_s6, %s1304_s7  }
  0x2c   : > { %p36_p1 = scmp.ge.s32.totalorder %s34_s25, 16  ;;  %s47_s16 = sadd.s32 1, %s1288_s11 }
  0x2d   : > { %p54_p2 = scmp.ne.s32.totalorder %s1288_s11, %s1284_s10  ;;  %p55_p4 = scmp.eq.s32.totalorder %s1300_s14, 0 }
  0x2e   : > { %s1600_s25 = smov (%p36_p1, %s34_s25), 0  ;;  %p1587_p8 = scmp.ne.s32.totalorder %s1581_s18, 0 }
  0x2f   : > { %p1415_p6 = por %p55_p4, %p54_p2  ;;  %s42_s24 = ssub.s32 %s1296_s13, %s1600_s25 }
  0x30   : > { %p1421_p11 = por %p1587_p8, %p54_p2  ;;  %p1058_p12 = scmp.lt.s32.totalorder %s1300_s14, 16 }
  0x31   : > { %p45_p10 = scmp.eq.s32.totalorder %s42_s24, 0  ;;  %s157_s23 = sand.u32 1, %s1288_s11  }
  0x32   : > { %s830_s27 = sshll.u32 %s157_s23, 7  ;;  %s892_s29 = sshll.u32 %s1296_s13, 11 }
  0x33   : > { %s1430_s28 = scalar_select %p45_p10, %s1288_s11, %s47_s16  }
  0x34   : > { %s1436_s4 = scalar_lea.hbm %s1573_s0, %s892_s29  ;;  %s161_s18 = scalar_lea.vmem [#allocation3], %s830_s27 }
  0x35   : > { %s171_s5 = sshll.u32 %s161_s18, 4  ;;  %p1442_p13 = pnand %p1058_p12, %p1415_p6  ;;  %s1438_s5 = int_to_ptr.vmem [resolvable:$true] %s171_s5 }
  0x36   : > { %s1446_s7 = scalar_lea.sflag [#allocation4], %s157_s23  ;;  %s1184_s8 = scalar_lea.hbm %s1436_s4, 2048 }
  0x37   : > { %p1185_p0 = scmp.ne.s32.totalorder %s1436_s4, %s1184_s8  ;;  %p1186_p3 = pneg %p1442_p13 }
  0x38   : > { %s1189_s22 = scalar_lea.hbm %s1573_s0, 32768  ;;  %p1190_p9 = scmp.lt.u32.totalorder %s1436_s4, %s1573_s0 }
  0x39   : > { %p1187_p5 = pnand %p1186_p3, %p1185_p0  ;;  %p1191_p1 = scmp.lt.u32.totalorder %s1189_s22, %s1184_s8 }
  0x3a   : > { %p1193_p4 = scmp.lt.u32.totalorder %s1184_s8, %s1436_s4 }
  0x3b   : > { %p1188_p7 = pneg %p1187_p5  ;;  %p1192_p2 = por %p1191_p1, %p1190_p9 }
  0x3d   : > { %p1194_p6 = por %p1193_p4, %p1192_p2 }
  0x3f   : > { %p1195_p8 = pnand %p1194_p6, %p1188_p7 }
  0x41   : > { %1198 = shalt.err (!%p1195_p8)
}
  0x42   : > { %s1199_s23 = scalar_lea.vmem %s1438_s5, 2048  ;;  %s1305_s29 = smov [#allocation3]  }
  0x43   : > { %p1200_p12 = scmp.ne.s32.totalorder %s1438_s5, %s1199_s23  ;;  %s1204_s30 = sshll.u32 %s1305_s29, 4  ;;  %s1205_s30 = int_to_ptr.vmem [resolvable:$false] %s1204_s30 }
  0x44   : > { %s1206_s3 = scalar_lea.vmem %s1205_s30, 4096  ;;  %p1207_p5 = scmp.lt.s32.totalorder %s1438_s5, %s1205_s30 }
  0x45   : > { %p1202_p10 = pnand %p1200_p12, %p1186_p3  ;;  %p1208_p9 = scmp.lt.s32.totalorder %s1206_s3, %s1199_s23 }
  0x47   : > { %p1203_p0 = pneg %p1202_p10  ;;  %p1209_p1 = por %p1208_p9, %p1207_p5 }
  0x49   : > { %p1210_p2 = pnand %p1209_p1, %p1203_p0 }
  0x4b   : > { %1213 = shalt.err (!%p1210_p2)
}
  0x4c   : > { %s1306_s18 = smov 128   ;;  %s1307_s8 = smov 8  }
  0x4d   : > { %1052 = dma.hbm_to_vmem [thread:$0]  (!%p1442_p13), %s1436_s4, 2048, %s1438_s5, %s1446_s7, %s1306_s18, %s1306_s18, %s1307_s8  }
  0x4e   : > { %p1590_p3 = scmp.ne.s32.totalorder %s1584_s21, 0 }
  0x4f   : > { %s1477_s15 = sand.u32 (!%p1590_p3), 1, %s1284_s10   ;;  %p1591_p7 = scmp.ne.s32.totalorder (!%p1590_p3), %s1582_s19, 0 }
  0x50   : > { %183 = sbr.rel (%p1590_p3) target bundleno = 382 (0x17e), region = 28  ;;  %s835_s16 = sshll.u32 (!%p1590_p3), %s1477_s15, 7 }
  0x51   : > { %s186_s22 = scalar_lea.sflag (!%p1590_p3), [#allocation4], %s1477_s15  ;;  %s1481_s24 = scalar_lea.vmem (!%p1590_p3), [#allocation3], %s835_s16 }
  0x57   : > { %1267 = dma.done.wait (%p1591_p7), %s186_s22, 2048  }
  0x58   : > { %1269 = vsyncadd (%p1591_p7), %s186_s22, 4294965248  ;;  %p1592_p13 = scmp.ne.s32.totalorder %s1580_s17, 0 }
  0x5a   : > { %1271 = dma.done.wait (%p1592_p13), [#allocation7], 2048  }
  0x5b   : > { %1273 = vsyncadd (%p1592_p13), [#allocation7], 4294965248  ;;  %v1116_v0 = vld [vmem:[#allocation6 + $0x40] sm:$0xff]   ;;  %v1118_v2 = vld [vmem:[#allocation6 + $0x48] sm:$0xff]   ;;  %s837_s17 = sshll.u32 %s1477_s15, 6  ;;  %s909_s4 = sshll.u32 %s1292_s12, 10 }
  0x5c   : > { %v1117_v1 = vld [vmem:[#allocation6] sm:$0xff]   ;;  %957 = vmatprep.subr.bf16.mxu0 %v1116_v0  ;;  %1021 = vmatprep.subr.bf16.mxu1 %v1116_v0  ;;  %v1119_v3 = vld [vmem:[#allocation6 + $0x8] sm:$0xff]   ;;  %v1120_v4 = vld [vmem:[#allocation6 + $0x50] sm:$0xff]   ;;  %s1508_s19 = scalar_lea.vmem [#allocation8], %s837_s17  ;;  %s1523_s7 = scalar_lea.hbm %s1575_s2, %s909_s4 }
  0x5d   : > { %958 = vmatpush3.bf16.msra.mxu0 %v1117_v1  ;;  %1029 = vmatpush3.bf16.msra.mxu1 %v1117_v1  ;;  %v1121_v5 = vld [vmem:[#allocation6 + $0x10] sm:$0xff]   ;;  %v1122_v6 = vld [vmem:[#allocation6 + $0x58] sm:$0xff]   ;;  %v1124_v8 = vld [vmem:[#allocation6 + $0x60] sm:$0xff]   ;;  %s722_s21 = sshll.u32 %s1508_s19, 4  ;;  %s708_s27 = scalar_lea.sflag [#allocation5], %s1477_s15  ;;  %s1518_s21 = int_to_ptr.vmem [resolvable:$true] %s722_s21 }
  0x5e   : > { %959 = vmatprep.subr.bf16.mxu0 %v1118_v2  ;;  %1022 = vmatprep.subr.bf16.mxu1 %v1118_v2  ;;  %v1123_v7 = vld [vmem:[#allocation6 + $0x18] sm:$0xff]   ;;  %v1125_v9 = vld [vmem:[#allocation6 + $0x20] sm:$0xff]   ;;  %v1126_v10 = vld [vmem:[#allocation6 + $0x68] sm:$0xff]   ;;  %s1214_s12 = scalar_lea.vmem %s1518_s21, 1024  ;;  %s1308_s23 = smov [#allocation8]  }
  0x5f   : > { %v1134_v11 = vld [vmem:[%s1481_s24 + $0x4] ss:$8 sps:$4 sm:$0xff]   ;;  %v1128_v14 = vld [vmem:[#allocation6 + $0x70] sm:$0xff]   ;;  %v1130_v16 = vld [vmem:[#allocation6 + $0x78] sm:$0xff]   ;;  %p1215_p4 = scmp.ne.s32.totalorder %s1518_s21, %s1214_s12  ;;  %s1218_s29 = sshll.u32 %s1308_s23, 4  ;;  %s1219_s29 = int_to_ptr.vmem [resolvable:$false] %s1218_s29 }
  0x60   : > { %v1137_v12 = vld [vmem:[%s1481_s24 + $0x44] ss:$8 sps:$4 sm:$0xff]   ;;  %511 = vmatprep.mubr.bf16.mxu0 %v1134_v11  ;;  %v1129_v15 = vld [vmem:[#allocation6 + $0x30] sm:$0xff]   ;;  %v1131_v17 = vld [vmem:[#allocation6 + $0x38] sm:$0xff]   ;;  %s1220_s30 = scalar_lea.vmem %s1219_s29, 2048  ;;  %p1221_p12 = scmp.lt.s32.totalorder %s1518_s21, %s1219_s29 }
  0x61   : > { %960 = vmatpush3.bf16.msra.mxu0 %v1119_v3  ;;  %1030 = vmatpush3.bf16.msra.mxu1 %v1119_v3  ;;  %v1127_v13 = vld [vmem:[#allocation6 + $0x28] sm:$0xff]   ;;  %v1138_v20 = vld [vmem:[%s1481_s24 + $0x14] ss:$8 sps:$4 sm:$0xff]   ;;  %v1142_v22 = vld [vmem:[%s1481_s24 + $0x10] ss:$8 sps:$4 sm:$0xff]   ;;  %p1216_p6 = pnand %p1215_p4, %p1421_p11  ;;  %p1222_p10 = scmp.lt.s32.totalorder %s1220_s30, %s1214_s12 }
  0x62   : > { %961 = vmatprep.subr.bf16.mxu0 %v1120_v4  ;;  %1023 = vmatprep.subr.bf16.mxu1 %v1120_v4  ;;  %v1132_v18 = vld [vmem:[%s1481_s24] ss:$8 sps:$4 sm:$0xff]   ;;  %v1140_v21 = vld [vmem:[%s1481_s24 + $0x54] ss:$8 sps:$4 sm:$0xff]   ;;  %v1143_v23 = vld [vmem:[%s1481_s24 + $0x50] ss:$8 sps:$4 sm:$0xff]  }
  0x63   : > { %543 = vmatprep.mubr.bf16.mxu1 %v1137_v12  ;;  %v1135_v19 = vld [vmem:[%s1481_s24 + $0x40] ss:$8 sps:$4 sm:$0xff]   ;;  %v1144_v24 = vld [vmem:[%s1481_s24 + $0x24] ss:$8 sps:$4 sm:$0xff]   ;;  %v1150_v28 = vld [vmem:[%s1481_s24 + $0x34] ss:$8 sps:$4 sm:$0xff]   ;;  %p1217_p8 = pneg %p1216_p6  ;;  %p1223_p0 = por %p1222_p10, %p1221_p12 }
  0x64   : > { %v1146_v25 = vld [vmem:[%s1481_s24 + $0x64] ss:$8 sps:$4 sm:$0xff]   ;;  %v1148_v26 = vld [vmem:[%s1481_s24 + $0x20] ss:$8 sps:$4 sm:$0xff]   ;;  %v1152_v29 = vld [vmem:[%s1481_s24 + $0x74] ss:$8 sps:$4 sm:$0xff]  }
  0x65   : > { %962 = vmatpush3.bf16.msra.mxu0 %v1121_v5  ;;  %1031 = vmatpush3.bf16.msra.mxu1 %v1121_v5  ;;  %v1149_v27 = vld [vmem:[%s1481_s24 + $0x60] ss:$8 sps:$4 sm:$0xff]   ;;  %v1154_v30 = vld [vmem:[%s1481_s24 + $0x30] ss:$8 sps:$4 sm:$0xff]   ;;  %p1224_p5 = pnand %p1223_p0, %p1217_p8 }
  0x66   : > { %963 = vmatprep.subr.bf16.mxu0 %v1122_v6  ;;  %1024 = vmatprep.subr.bf16.mxu1 %v1122_v6  ;;  %v1155_v31 = vld [vmem:[%s1481_s24 + $0x70] ss:$8 sps:$4 sm:$0xff]  }
  0x69   : > { %964 = vmatpush3.bf16.msra.mxu0 %v1123_v7  ;;  %1032 = vmatpush3.bf16.msra.mxu1 %v1123_v7 }
  0x6a   : > { %965 = vmatprep.subr.bf16.mxu0 %v1124_v8  ;;  %1025 = vmatprep.subr.bf16.mxu1 %v1124_v8 }
  0x6d   : > { %966 = vmatpush3.bf16.msra.mxu0 %v1125_v9  ;;  %1033 = vmatpush3.bf16.msra.mxu1 %v1125_v9 }
  0x6e   : > { %967 = vmatprep.subr.bf16.mxu0 %v1126_v10  ;;  %1026 = vmatprep.subr.bf16.mxu1 %v1126_v10 }
  0x71   : > { %968 = vmatpush3.bf16.msra.mxu0 %v1127_v13  ;;  %1034 = vmatpush3.bf16.msra.mxu1 %v1127_v13 }
  0x72   : > { %969 = vmatprep.subr.bf16.mxu0 %v1128_v14  ;;  %1027 = vmatprep.subr.bf16.mxu1 %v1128_v14 }
  0x75   : > { %970 = vmatpush3.bf16.msra.mxu0 %v1129_v15  ;;  %1035 = vmatpush3.bf16.msra.mxu1 %v1129_v15 }
  0x76   : > { %971 = vmatprep.subr.bf16.mxu0 %v1130_v16  ;;  %1028 = vmatprep.subr.bf16.mxu1 %v1130_v16 }
  0x79   : > { %972 = vmatpush3.bf16.msra.mxu0 %v1131_v17  ;;  %1036 = vmatpush3.bf16.msra.mxu1 %v1131_v17 }
  0x7c   : > { %512 = vmatmul.mubr.bf16.vlgmr.msra.gmra.mrb[0].mxu0 %v1132_v18  ;;  %544 = vmatmul.mubr.bf16.vlgmr.msra.gmra.mrb[0].mxu1 %v1135_v19 }
  0x7d   : > { %519 = vmatprep.mubr.bf16.mxu0 %v1138_v20  ;;  %551 = vmatprep.mubr.bf16.mxu1 %v1140_v21 }
  0x84   : > { %520 = vmatmul.mubr.bf16.gmra.mrb[4].mxu0 %v1142_v22  ;;  %552 = vmatmul.mubr.bf16.gmra.mrb[4].mxu1 %v1143_v23 }
  0x85   : > { %527 = vmatprep.mubr.bf16.mxu0 %v1144_v24  ;;  %559 = vmatprep.mubr.bf16.mxu1 %v1146_v25 }
  0x8c   : > { %528 = vmatmul.mubr.bf16.gmra.mrb[8].mxu0 %v1148_v26  ;;  %560 = vmatmul.mubr.bf16.gmra.mrb[8].mxu1 %v1149_v27 }
  0x8d   : > { %535 = vmatprep.mubr.bf16.mxu0 %v1150_v28  ;;  %567 = vmatprep.mubr.bf16.mxu1 %v1152_v29 }
  0x94   : > { %536 = vmatmul.mubr.bf16.gmra.mrb[12].mxu0 %v1154_v30  ;;  %568 = vmatmul.mubr.bf16.gmra.mrb[12].mxu1 %v1155_v31 }
 0x14f   : > { %v973_v32 = vpop.f32.mrb[0].mxu0  ;;  %v997_v33 = vpop.f32.mrb[0].mxu1 }
 0x150   : > { %v974_v34 = vpop.f32.mrb[1].mxu0  ;;  %v998_v35 = vpop.f32.mrb[1].mxu1 }
 0x151   : > { %v975_v36 = vadd.f32 %v974_v34, %v973_v32  ;;  %v999_v37 = vadd.f32 %v998_v35, %v997_v33  ;;  %v976_v38 = vpop.f32.mrb[2].mxu0  ;;  %v1000_v39 = vpop.f32.mrb[2].mxu1 }
 0x152   : > { %v977_v40 = vpop.f32.mrb[3].mxu0  ;;  %v1001_v41 = vpop.f32.mrb[3].mxu1 }
 0x153   : > { %v978_v42 = vadd.f32 %v977_v40, %v976_v38  ;;  %v1002_v43 = vadd.f32 %v1001_v41, %v1000_v39 }
 0x155   : > { %v913_v44 = vpack.c.bf16 %v978_v42, %v975_v36  ;;  %v933_v45 = vpack.c.bf16 %v1002_v43, %v999_v37 }
 0x157   : > { %914 = vst [vmem:[%s1508_s19] sm:$0xff] %v913_v44   ;;  %953 = vst [vmem:[%s1508_s19 + $0x20] sm:$0xff] %v933_v45   ;;  %v979_v46 = vpop.f32.mrb[4].mxu0  ;;  %v1003_v47 = vpop.f32.mrb[4].mxu1 }
 0x158   : > { %v980_v48 = vpop.f32.mrb[5].mxu0  ;;  %v1004_v49 = vpop.f32.mrb[5].mxu1 }
 0x159   : > { %v981_v50 = vadd.f32 %v980_v48, %v979_v46  ;;  %v1005_v51 = vadd.f32 %v1004_v49, %v1003_v47  ;;  %v982_v52 = vpop.f32.mrb[6].mxu0  ;;  %v1006_v53 = vpop.f32.mrb[6].mxu1 }
 0x15a   : > { %v983_v54 = vpop.f32.mrb[7].mxu0  ;;  %v1007_v55 = vpop.f32.mrb[7].mxu1 }
 0x15b   : > { %v984_v56 = vadd.f32 %v983_v54, %v982_v52  ;;  %v1008_v57 = vadd.f32 %v1007_v55, %v1006_v53 }
 0x15d   : > { %v918_v58 = vpack.c.bf16 %v984_v56, %v981_v50  ;;  %v938_v59 = vpack.c.bf16 %v1008_v57, %v1005_v51 }
 0x15f   : > { %950 = vst [vmem:[%s1508_s19 + $0x8] sm:$0xff] %v918_v58   ;;  %954 = vst [vmem:[%s1508_s19 + $0x28] sm:$0xff] %v938_v59   ;;  %v985_v60 = vpop.f32.mrb[8].mxu0  ;;  %v1009_v61 = vpop.f32.mrb[8].mxu1 }
 0x160   : > { %v986_v62 = vpop.f32.mrb[9].mxu0  ;;  %v1010_v63 = vpop.f32.mrb[9].mxu1 }
 0x161   : > { %v987_v0 = vadd.f32 %v986_v62, %v985_v60  ;;  %v1011_v1 = vadd.f32 %v1010_v63, %v1009_v61  ;;  %v988_v2 = vpop.f32.mrb[10].mxu0  ;;  %v1012_v3 = vpop.f32.mrb[10].mxu1 }
 0x162   : > { %v989_v4 = vpop.f32.mrb[11].mxu0  ;;  %v1013_v5 = vpop.f32.mrb[11].mxu1 }
 0x163   : > { %v990_v6 = vadd.f32 %v989_v4, %v988_v2  ;;  %v1014_v7 = vadd.f32 %v1013_v5, %v1012_v3 }
 0x165   : > { %v923_v8 = vpack.c.bf16 %v990_v6, %v987_v0  ;;  %v943_v9 = vpack.c.bf16 %v1014_v7, %v1011_v1 }
 0x167   : > { %951 = vst [vmem:[%s1508_s19 + $0x10] sm:$0xff] %v923_v8   ;;  %955 = vst [vmem:[%s1508_s19 + $0x30] sm:$0xff] %v943_v9   ;;  %v991_v10 = vpop.f32.mrb[12].mxu0  ;;  %v1015_v11 = vpop.f32.mrb[12].mxu1 }
 0x168   : > { %v992_v12 = vpop.f32.mrb[13].mxu0  ;;  %v1016_v13 = vpop.f32.mrb[13].mxu1 }
 0x169   : > { %v993_v14 = vadd.f32 %v992_v12, %v991_v10  ;;  %v1017_v15 = vadd.f32 %v1016_v13, %v1015_v11  ;;  %v994_v16 = vpop.f32.mrb[14].mxu0  ;;  %v1018_v17 = vpop.f32.mrb[14].mxu1 }
 0x16a   : > { %v995_v18 = vpop.f32.mrb[15].mxu0  ;;  %v1019_v19 = vpop.f32.mrb[15].mxu1 }
 0x16b   : > { %v996_v20 = vadd.f32 %v995_v18, %v994_v16  ;;  %v1020_v21 = vadd.f32 %v1019_v19, %v1018_v17 }
 0x16d   : > { %v928_v22 = vpack.c.bf16 %v996_v20, %v993_v14  ;;  %v948_v23 = vpack.c.bf16 %v1020_v21, %v1017_v15 }
 0x16f   : > { %952 = vst [vmem:[%s1508_s19 + $0x18] sm:$0xff] %v928_v22   ;;  %956 = vst [vmem:[%s1508_s19 + $0x38] sm:$0xff] %v948_v23  }
 0x170   : > { %1227 = shalt.err (!%p1224_p5)
}
 0x171   : > { %s1228_s3 = scalar_lea.hbm %s1523_s7, 1024  ;;  %s1232_s16 = scalar_lea.hbm %s1575_s2, 16384 }
 0x172   : > { %p1229_p9 = scmp.ne.s32.totalorder %s1523_s7, %s1228_s3  ;;  %p1233_p3 = scmp.lt.u32.totalorder %s1523_s7, %s1575_s2 }
 0x173   : > { %p1234_p7 = scmp.lt.u32.totalorder %s1232_s16, %s1228_s3  ;;  %p1236_p4 = scmp.lt.u32.totalorder %s1228_s3, %s1523_s7 }
 0x174   : > { %p1230_p1 = pnand %p1229_p9, %p1421_p11 }
 0x175   : > { %p1235_p13 = por %p1234_p7, %p1233_p3 }
 0x176   : > { %p1231_p2 = pneg %p1230_p1 }
 0x177   : > { %p1237_p6 = por %p1236_p4, %p1235_p13 }
 0x179   : > { %p1238_p8 = pnand %p1237_p6, %p1231_p2 }
 0x17b   : > { %1241 = shalt.err (!%p1238_p8)
}
 0x17c   : > { %s1309_s17 = smov 64   ;;  %s1310_s19 = smov 4  }
 0x17d   : > { %1043 = dma.vmem_to_hbm [thread:$0]  (%p1421_p11), %s1518_s21, 1024, %s1523_s7, %s708_s27, %s1309_s17, %s1309_s17, %s1310_s19  }
 0x17e PF: > { %p1060_p12 = scmp.ge.s32.totalorder %s1300_s14, 2  ;;  %s737_s4 = sand.u32 1, %s1280_s9  }
 0x17f   : > { %p1593_p10 = scmp.ne.s32.totalorder %s1583_s20, 0  ;;  %s738_s5 = scalar_lea.sflag [#allocation5], %s737_s4 }
 0x181   : > { %p1054_p0 = pnand %p1060_p12, %p1593_p10 }
 0x183   : > { %1275 = dma.done.wait (!%p1054_p0), %s738_s5, 1024  }
 0x184   : > { %1277 = vsyncadd (!%p1054_p0), %s738_s5, 4294966272  ;;  %s19_s14 = sadd.s32 1, %s1300_s14   ;;  %s1594_s9 = smov %s1284_s10 }
 0x185   : > { %p16_p5 = scmp.ge.s32.totalorder %s19_s14, 18   ;;  %s1595_s10 = smov %s1288_s11 }
 0x186   : > { %s1596_s11 = smov %s1430_s28  ;;  %s1597_s12 = smov %s1296_s13 }
 0x187   : > { %s1598_s13 = smov %s1600_s25  ;;  %18 = sbr.rel (!%p16_p5) target bundleno = 7 (0x7), region = 86 }
 0x18e   :  { %743 = vsyncpa [#allocation4], 1 }
 0x18f   :  { %745 = vsyncpa [#allocation4 + $0x1], 1 }
 0x190   :  { %746 = vsyncpa [#allocation7], 1 }
 0x191   :  { %747 = vsyncpa [#allocation5], 1 }
 0x192   :  { %749 = vsyncpa [#allocation5 + $0x1], 1 }

</bundles_post_ra>
